<compile_context>
chip_gen: v7x
topology: tpu7x:2x2x1
jax: 0.10.0
libtpu: 0.0.40
codegen_flags: <defaults>
</compile_context>

<pallas_src>
import jax
import jax.numpy as jnp
from jax import lax
from jax.experimental import pallas as pl
from jax.experimental.pallas import tpu as pltpu


def _liquid_s4_recurrence_kernel(uB_ref, ALK_ref, Ab_ref, hs_ref, h_scr, uprev_scr):
    """One grid step = one chunk of TB time steps.

    uB_ref   : (TB, B, N)  precomputed x @ B for this time chunk (time-major)
    ALK_ref  : (N, 2N)     fused [A | liquid_kernel]
    Ab_ref   : (1, N)      A_bias
    hs_ref   : (TB, B, N)  hidden-state outputs for this chunk
    h_scr    : (B, N)      running hidden state (persists across chunks)
    uprev_scr: (B, N)      uB of the previous time step (persists across chunks)
    """
    c = pl.program_id(0)

    @pl.when(c == 0)
    def _():
        h_scr[...] = jnp.zeros_like(h_scr)
        uprev_scr[...] = jnp.zeros_like(uprev_scr)

    b, n = h_scr.shape
    tb = uB_ref.shape[0]
    inv_n = jnp.float32(1.0 / n)
    inv_sqrt2 = jnp.float32(0.7071067811865476)

    # Hoist constant loads / broadcasts out of the (partially unrolled) time loop.
    # JAX does not CSE broadcast_in_dim -> doing this inside step() would re-emit the
    # (1,N)->(B,N) broadcast on every unrolled iteration of the hot serial loop.
    ALK = ALK_ref[...]                                   # (N, 2N)
    Ab_b = jnp.broadcast_to(Ab_ref[...], (b, n))         # (B, N)

    def step(i, carry):
        h, u_prev = carry                                # (B, N), (B, N)
        u_t = uB_ref[i]                                  # (B, N)

        # Single fused recurrent matmul on the serial chain: h @ [A | LK].
        # TODO(synk): bf16-casting h/ALK (keeping preferred_element_type=f32) halves MXU
        # latency on v5e/v6e/v7x, and pltpu.matmul_push_rhs could hold ALK MXU-resident
        # across the whole chunk; both skipped pending tolerance / lowering validation
        # at these tiny (B=2, N=32) tiles.
        hALK = jnp.dot(h, ALK, preferred_element_type=jnp.float32)   # (B, 2N)
        hA = hALK[:, :n]
        hLK = hALK[:, n:]

        # At the global t==0, h==0 exactly -> hLK==0, so the (zero-initialized) u_prev
        # contributes nothing; correct per the reference's t>0 guard.
        pre = hA + Ab_b + u_t + hLK * u_prev

        # LayerNorm over the state dim (weight=1, bias=0, eps=1e-5, biased variance).
        # Independent sum(x) / sum(x*x) reductions -> the two XLU reduces co-issue
        # (var = E[x^2] - mean^2) instead of reduce -> subtract -> reduce.
        s1 = jnp.sum(pre, axis=-1, keepdims=True)
        s2 = jnp.sum(pre * pre, axis=-1, keepdims=True)
        mean = s1 * inv_n
        var = jnp.maximum(s2 * inv_n - mean * mean, 0.0)
        normed = (pre - mean) * lax.rsqrt(var + 1e-5)

        # Exact (erf) GELU, matching torch.nn.GELU() default.
        act = 0.5 * normed * (1.0 + lax.erf(normed * inv_sqrt2))

        h_new = h + act
        hs_ref[i] = h_new                 # output projection is hoisted to the wrapper
        return h_new, u_t

    h_fin, u_fin = lax.fori_loop(0, tb, step, (h_scr[...], uprev_scr[...]),
                                 unroll=min(8, tb))

    h_scr[...] = h_fin
    uprev_scr[...] = u_fin


def _pick_time_block(T, Bsz, N):
    """Largest time chunk that fits the pipelined-block VMEM budget and divides T.

    Per-chunk working set = uB in-block + hs out-block, each double-buffered by the
    auto-pipeline: 2 arrays x 2 buffers x TB*B*N*4 bytes. Budgeted conservatively for
    v7x (64 MiB physical / 32 MiB default scoped VMEM per TensorCore); v5e/v6e have
    more headroom and simply get the same (T-capped) chunk.
    """
    budget = 8 << 20
    bytes_per_step = 2 * 2 * Bsz * N * 4
    tb = max(1, min(T, budget // max(1, bytes_per_step)))
    for cand in range(tb, 0, -1):        # prefer TB | T -> no padded-tail uB copy
        if T % cand == 0:
            return cand
    return tb


def single_liquid_s4_forward(inputs, params, *, time_block=None):
    """inputs: (B, T, D_in) float32. Returns (outputs (B,T,D_out), hidden_states (B,T,N))."""
    Bsz, T, _ = inputs.shape
    A = params["A"]
    Bm = params["B"]
    C = params["C"]
    LK = params["liquid_kernel"]
    Ab = params["A_bias"].reshape(1, -1)
    N = A.shape[0]

    # Fuse the two recurrent weight matrices -> one MXU dot per time step in-kernel.
    # (A_bias is deliberately NOT folded into uB: the hLK * u_prev interaction uses the
    # raw inputs @ B, without the bias.)
    ALK = jnp.concatenate([A, LK], axis=1)                 # (N, 2N)

    # Hoisted input projection: one big MXU matmul, produced directly time-major.
    uB = jnp.einsum('btd,dn->tbn', inputs, Bm,
                    preferred_element_type=jnp.float32)    # (T, B, N)

    TB = _pick_time_block(T, Bsz, N) if time_block is None else max(1, min(time_block, T))
    T_pad = ((T + TB - 1) // TB) * TB
    if T_pad != T:
        # Only reached when an explicit time_block does not divide T. Padded steps run
        # on zero inputs after the real sequence; padded rows are dropped below (the
        # carried scratch state is polluted by the tail but never reused).
        uB = jnp.pad(uB, ((0, T_pad - T), (0, 0), (0, 0)))
    num_chunks = T_pad // TB

    # TODO(synk): on v7x a leading batch-parallel grid axis (dimension_semantics=
    # ("parallel","arbitrary")) would run an independent recurrence per TensorCore over
    # half the batch; omitted here (batch=2 toy shape, needs B padded to satisfy the
    # (8,128)/full-dim BlockSpec rule).
    hs_tm = pl.pallas_call(
        _liquid_s4_recurrence_kernel,
        out_shape=jax.ShapeDtypeStruct((T_pad, Bsz, N), jnp.float32),
        grid_spec=pltpu.PrefetchScalarGridSpec(
            num_scalar_prefetch=0,
            grid=(num_chunks,),
            in_specs=[
                pl.BlockSpec((TB, Bsz, N), lambda c: (c, 0, 0)),   # uB time chunk
                pl.BlockSpec((N, 2 * N), lambda c: (0, 0)),        # fused [A | LK]
                pl.BlockSpec((1, N), lambda c: (0, 0)),            # A_bias
            ],
            out_specs=pl.BlockSpec((TB, Bsz, N), lambda c: (c, 0, 0)),
            scratch_shapes=[
                pltpu.VMEM((Bsz, N), jnp.float32),                 # running hidden state
                pltpu.VMEM((Bsz, N), jnp.float32),                 # carried uB_prev
            ],
        ),
        compiler_params=pltpu.CompilerParams(dimension_semantics=("arbitrary",)),
    )(uB, ALK, Ab)

    hs_tm = hs_tm[:T]                                              # drop padded tail (no-op if TB | T)
    # Output projection directly from the TIME-MAJOR slab: one lane-dense matmul over
    # all T*B rows; only the small (T, B, D_out) result is transposed.
    out_tm = jnp.einsum('tbn,no->tbo', hs_tm, C,
                        preferred_element_type=jnp.float32)        # (T, B, D_out)
    outputs = jnp.transpose(out_tm, (1, 0, 2))                     # (B, T, D_out)
    hidden_states = jnp.transpose(hs_tm, (1, 0, 2))                # (B, T, N)
    return outputs, hidden_states


def _reference_forward(inputs, params):
    """Pure-JAX reference mirroring the PyTorch module step by step."""
    A, Bm, C = params["A"], params["B"], params["C"]
    LK, Ab = params["liquid_kernel"], params["A_bias"]
    Bsz, T, _ = inputs.shape
    N = A.shape[0]
    h = jnp.zeros((Bsz, N), jnp.float32)
    outs, hss = [], []
    for t in range(T):
        u_t = inputs[:, t, :]
        if t > 0:
            interaction = (h @ LK) * (inputs[:, t - 1, :] @ Bm)
        else:
            interaction = 0.0
        pre = h @ A + Ab + u_t @ Bm + interaction
        mean = pre.mean(-1, keepdims=True)
        var = ((pre - mean) ** 2).mean(-1, keepdims=True)
        normed = (pre - mean) / jnp.sqrt(var + 1e-5)
        act = 0.5 * normed * (1.0 + lax.erf(normed / jnp.sqrt(2.0)))
        h = h + act
        outs.append(h @ C)
        hss.append(h)
    return jnp.stack(outs, 1), jnp.stack(hss, 1)


def _xavier_uniform(key, shape):
    fan_in, fan_out = shape
    a = (6.0 / (fan_in + fan_out)) ** 0.5
    return jax.random.uniform(key, shape, jnp.float32, -a, a)


if __name__ == "__main__":
    # module hyper-params (liquid_order is unused in the forward pass)
    state_dim, input_dim, output_dim, liquid_order = 32, 16, 8, 2
    batch, seq_len = 2, 8

    key = jax.random.PRNGKey(0)
    k_a, k_b, k_c, k_lk, k_x = jax.random.split(key, 5)

    params = {
        "A": _xavier_uniform(k_a, (state_dim, state_dim)),
        "B": _xavier_uniform(k_b, (input_dim, state_dim)),
        "C": _xavier_uniform(k_c, (state_dim, output_dim)),
        "liquid_kernel": _xavier_uniform(k_lk, (state_dim, state_dim)),
        "A_bias": jnp.zeros((state_dim,), jnp.float32),
        # LayerNorm weight/bias default to ones/zeros -> folded into the kernel math.
    }

    x = jax.random.normal(k_x, (batch, seq_len, input_dim), jnp.float32)
    ref_out, ref_hs = _reference_forward(x, params)

    # Primary path: auto time_block -> TB = T for this shape (single grid step).
    fwd = jax.jit(lambda xx, pp: single_liquid_s4_forward(xx, pp))
    outputs, hidden_states = fwd(x, params)
    jax.block_until_ready((outputs, hidden_states))

    assert outputs.shape == (batch, seq_len, output_dim)
    assert hidden_states.shape == (batch, seq_len, state_dim)
    assert jnp.allclose(outputs, ref_out, atol=1e-3, rtol=1e-3)
    assert jnp.allclose(hidden_states, ref_hs, atol=1e-3, rtol=1e-3)

    # Secondary path: explicit time_block=4 -> 2 chunks, exercises the cross-chunk
    # scratch carry of (h, uB_prev).
    fwd_chunked = jax.jit(lambda xx, pp: single_liquid_s4_forward(xx, pp, time_block=4))
    out_c, hs_c = fwd_chunked(x, params)
    jax.block_until_ready((out_c, hs_c))
    assert jnp.allclose(out_c, ref_out, atol=1e-3, rtol=1e-3)
    assert jnp.allclose(hs_c, ref_hs, atol=1e-3, rtol=1e-3)

    print("KERNEL_OK")
</pallas_src>

<mosaic_0001>
module attributes {stable_mosaic.version = 11 : i64} {
  func.func @_liquid_s4_recurrence_kernel(%arg0: i32, %arg1: memref<8x2x32xf32, #tpu.memory_space<vmem>>, %arg2: memref<32x64xf32, #tpu.memory_space<vmem>>, %arg3: memref<1x32xf32, #tpu.memory_space<vmem>>, %arg4: memref<8x2x32xf32, #tpu.memory_space<vmem>>, %arg5: memref<2x32xf32, #tpu.memory_space<vmem>>, %arg6: memref<2x32xf32, #tpu.memory_space<vmem>>) attributes {dimension_semantics = [#tpu.dimension_semantics<arbitrary>], iteration_bounds = array<i64: 1>, scalar_prefetch = 0 : i64, scratch_operands = 2 : i64, tpu.core_type = #tpu.core_type<tc>, window_params = [{transform_indices = @transform_0, window_bounds = array<i64: 8, 2, 32>}, {pipeline_mode = #tpu.pipeline_mode<synchronous>, transform_indices = @transform_1, window_bounds = array<i64: 32, 64>}, {pipeline_mode = #tpu.pipeline_mode<synchronous>, transform_indices = @transform_2, window_bounds = array<i64: 1, 32>}, {transform_indices = @transform_3, window_bounds = array<i64: 8, 2, 32>}]} {
    %c0_i32 = arith.constant 0 : i32
    %0 = arith.cmpi eq, %arg0, %c0_i32 : i32
    %1 = arith.extui %0 : i1 to i32
    %c0_i32_0 = arith.constant 0 : i32
    %2 = arith.cmpi ne, %1, %c0_i32_0 : i32
    scf.if %2 {
      %cst_102 = arith.constant 0.000000e+00 : f32
      %355 = vector.broadcast %cst_102 : f32 to vector<2x32xf32>
      %c0_103 = arith.constant 0 : index
      %c0_104 = arith.constant 0 : index
      %356 = vector.load %arg5[%c0_103, %c0_104] : memref<2x32xf32, #tpu.memory_space<vmem>>, vector<2x32xf32>
      tpu.vector_store %arg5[%c0_103, %c0_104], %355 {strides = array<i32>} : memref<2x32xf32, #tpu.memory_space<vmem>>, vector<2x32xf32>,
      %cst_105 = arith.constant 0.000000e+00 : f32
      %357 = vector.broadcast %cst_105 : f32 to vector<2x32xf32>
      %c0_106 = arith.constant 0 : index
      %c0_107 = arith.constant 0 : index
      %358 = vector.load %arg6[%c0_106, %c0_107] : memref<2x32xf32, #tpu.memory_space<vmem>>, vector<2x32xf32>
      tpu.vector_store %arg6[%c0_106, %c0_107], %357 {strides = array<i32>} : memref<2x32xf32, #tpu.memory_space<vmem>>, vector<2x32xf32>,
    } else {
    }
    %c0 = arith.constant 0 : index
    %c0_1 = arith.constant 0 : index
    %3 = vector.load %arg2[%c0, %c0_1] : memref<32x64xf32, #tpu.memory_space<vmem>>, vector<32x64xf32>
    %c0_2 = arith.constant 0 : index
    %c0_3 = arith.constant 0 : index
    %4 = vector.load %arg3[%c0_2, %c0_3] : memref<1x32xf32, #tpu.memory_space<vmem>>, vector<1x32xf32>
    %5 = vector.shape_cast %4 : vector<1x32xf32> to vector<1x32xf32>
    %6 = vector.broadcast %5 : vector<1x32xf32> to vector<2x32xf32>
    %c0_4 = arith.constant 0 : index
    %c0_5 = arith.constant 0 : index
    %7 = vector.load %arg5[%c0_4, %c0_5] : memref<2x32xf32, #tpu.memory_space<vmem>>, vector<2x32xf32>
    %c0_6 = arith.constant 0 : index
    %c0_7 = arith.constant 0 : index
    %8 = vector.load %arg6[%c0_6, %c0_7] : memref<2x32xf32, #tpu.memory_space<vmem>>, vector<2x32xf32>
    %cst = arith.constant 3.125000e-02 : f32
    %cst_8 = arith.constant 0.707106769 : f32
    %c0_i32_9 = arith.constant 0 : i32
    %9 = arith.index_cast %c0_i32_9 : i32 to index
    %c0_10 = arith.constant 0 : index
    %c0_11 = arith.constant 0 : index
    %10 = vector.load %arg1[%9, %c0_10, %c0_11] : memref<8x2x32xf32, #tpu.memory_space<vmem>>, vector<1x2x32xf32>
    %11 = vector.shape_cast %10 : vector<1x2x32xf32> to vector<2x32xf32>
    %cst_12 = arith.constant dense<0.000000e+00> : vector<2x64xf32>
    %12 = tpu.matmul %7, %3, %cst_12 {dimension_numbers = #tpu.dot_dimension_numbers<[1], [0], [0], [1], [0, 0, 1, 1], [], []>} : vector<2x32xf32>, vector<32x64xf32>, vector<2x64xf32> -> vector<2x64xf32>
    %13 = vector.extract_strided_slice %12 {offsets = [0, 0], sizes = [2, 32], strides = [1, 1]} : vector<2x64xf32> to vector<2x32xf32>
    %14 = vector.extract_strided_slice %12 {offsets = [0, 32], sizes = [2, 32], strides = [1, 1]} : vector<2x64xf32> to vector<2x32xf32>
    %15 = arith.addf %13, %6 : vector<2x32xf32>
    %16 = arith.addf %15, %11 : vector<2x32xf32>
    %17 = arith.mulf %14, %8 : vector<2x32xf32>
    %18 = arith.addf %16, %17 : vector<2x32xf32>
    %cst_13 = arith.constant dense<0.000000e+00> : vector<2xf32>
    %19 = vector.multi_reduction <add>, %18, %cst_13 [1] : vector<2x32xf32> to vector<2xf32>
    %20 = vector.shape_cast %19 : vector<2xf32> to vector<2x1xf32>
    %21 = arith.mulf %18, %18 : vector<2x32xf32>
    %cst_14 = arith.constant dense<0.000000e+00> : vector<2xf32>
    %22 = vector.multi_reduction <add>, %21, %cst_14 [1] : vector<2x32xf32> to vector<2xf32>
    %23 = vector.shape_cast %22 : vector<2xf32> to vector<2x1xf32>
    %24 = vector.broadcast %cst : f32 to vector<2x1xf32>
    %25 = arith.mulf %20, %24 : vector<2x1xf32>
    %26 = vector.broadcast %cst : f32 to vector<2x1xf32>
    %27 = arith.mulf %23, %26 : vector<2x1xf32>
    %28 = arith.mulf %25, %25 : vector<2x1xf32>
    %29 = arith.subf %27, %28 : vector<2x1xf32>
    %cst_15 = arith.constant 0.000000e+00 : f32
    %30 = vector.broadcast %cst_15 : f32 to vector<2x1xf32>
    %31 = arith.maximumf %29, %30 : vector<2x1xf32>
    %32 = vector.broadcast %25 : vector<2x1xf32> to vector<2x32xf32>
    %33 = arith.subf %18, %32 : vector<2x32xf32>
    %cst_16 = arith.constant 9.99999974E-6 : f32
    %34 = vector.broadcast %cst_16 : f32 to vector<2x1xf32>
    %35 = arith.addf %31, %34 : vector<2x1xf32>
    %36 = math.rsqrt %35 : vector<2x1xf32>
    %37 = vector.broadcast %36 : vector<2x1xf32> to vector<2x32xf32>
    %38 = arith.mulf %33, %37 : vector<2x32xf32>
    %cst_17 = arith.constant 5.000000e-01 : f32
    %39 = vector.broadcast %cst_17 : f32 to vector<2x32xf32>
    %40 = arith.mulf %39, %38 : vector<2x32xf32>
    %41 = vector.broadcast %cst_8 : f32 to vector<2x32xf32>
    %42 = arith.mulf %38, %41 : vector<2x32xf32>
    %43 = math.erf %42 : vector<2x32xf32>
    %cst_18 = arith.constant 1.000000e+00 : f32
    %44 = vector.broadcast %cst_18 : f32 to vector<2x32xf32>
    %45 = arith.addf %44, %43 : vector<2x32xf32>
    %46 = arith.mulf %40, %45 : vector<2x32xf32>
    %47 = arith.addf %7, %46 : vector<2x32xf32>
    %48 = arith.index_cast %c0_i32_9 : i32 to index
    %c0_19 = arith.constant 0 : index
    %c0_20 = arith.constant 0 : index
    %49 = vector.load %arg4[%48, %c0_19, %c0_20] : memref<8x2x32xf32, #tpu.memory_space<vmem>>, vector<1x2x32xf32>
    %50 = vector.shape_cast %49 : vector<1x2x32xf32> to vector<2x32xf32>
    %51 = vector.shape_cast %47 : vector<2x32xf32> to vector<1x2x32xf32>
    tpu.vector_store %arg4[%48, %c0_19, %c0_20], %51 {strides = array<i32>} : memref<8x2x32xf32, #tpu.memory_space<vmem>>, vector<1x2x32xf32>,
    %c1_i32 = arith.constant 1 : i32
    %52 = arith.index_cast %c1_i32 : i32 to index
    %c0_21 = arith.constant 0 : index
    %c0_22 = arith.constant 0 : index
    %53 = vector.load %arg1[%52, %c0_21, %c0_22] : memref<8x2x32xf32, #tpu.memory_space<vmem>>, vector<1x2x32xf32>
    %54 = vector.shape_cast %53 : vector<1x2x32xf32> to vector<2x32xf32>
    %cst_23 = arith.constant dense<0.000000e+00> : vector<2x64xf32>
    %55 = tpu.matmul %47, %3, %cst_23 {dimension_numbers = #tpu.dot_dimension_numbers<[1], [0], [0], [1], [0, 0, 1, 1], [], []>} : vector<2x32xf32>, vector<32x64xf32>, vector<2x64xf32> -> vector<2x64xf32>
    %56 = vector.extract_strided_slice %55 {offsets = [0, 0], sizes = [2, 32], strides = [1, 1]} : vector<2x64xf32> to vector<2x32xf32>
    %57 = vector.extract_strided_slice %55 {offsets = [0, 32], sizes = [2, 32], strides = [1, 1]} : vector<2x64xf32> to vector<2x32xf32>
    %58 = arith.addf %56, %6 : vector<2x32xf32>
    %59 = arith.addf %58, %54 : vector<2x32xf32>
    %60 = arith.mulf %57, %11 : vector<2x32xf32>
    %61 = arith.addf %59, %60 : vector<2x32xf32>
    %cst_24 = arith.constant dense<0.000000e+00> : vector<2xf32>
    %62 = vector.multi_reduction <add>, %61, %cst_24 [1] : vector<2x32xf32> to vector<2xf32>
    %63 = vector.shape_cast %62 : vector<2xf32> to vector<2x1xf32>
    %64 = arith.mulf %61, %61 : vector<2x32xf32>
    %cst_25 = arith.constant dense<0.000000e+00> : vector<2xf32>
    %65 = vector.multi_reduction <add>, %64, %cst_25 [1] : vector<2x32xf32> to vector<2xf32>
    %66 = vector.shape_cast %65 : vector<2xf32> to vector<2x1xf32>
    %67 = vector.broadcast %cst : f32 to vector<2x1xf32>
    %68 = arith.mulf %63, %67 : vector<2x1xf32>
    %69 = vector.broadcast %cst : f32 to vector<2x1xf32>
    %70 = arith.mulf %66, %69 : vector<2x1xf32>
    %71 = arith.mulf %68, %68 : vector<2x1xf32>
    %72 = arith.subf %70, %71 : vector<2x1xf32>
    %cst_26 = arith.constant 0.000000e+00 : f32
    %73 = vector.broadcast %cst_26 : f32 to vector<2x1xf32>
    %74 = arith.maximumf %72, %73 : vector<2x1xf32>
    %75 = vector.broadcast %68 : vector<2x1xf32> to vector<2x32xf32>
    %76 = arith.subf %61, %75 : vector<2x32xf32>
    %cst_27 = arith.constant 9.99999974E-6 : f32
    %77 = vector.broadcast %cst_27 : f32 to vector<2x1xf32>
    %78 = arith.addf %74, %77 : vector<2x1xf32>
    %79 = math.rsqrt %78 : vector<2x1xf32>
    %80 = vector.broadcast %79 : vector<2x1xf32> to vector<2x32xf32>
    %81 = arith.mulf %76, %80 : vector<2x32xf32>
    %cst_28 = arith.constant 5.000000e-01 : f32
    %82 = vector.broadcast %cst_28 : f32 to vector<2x32xf32>
    %83 = arith.mulf %82, %81 : vector<2x32xf32>
    %84 = vector.broadcast %cst_8 : f32 to vector<2x32xf32>
    %85 = arith.mulf %81, %84 : vector<2x32xf32>
    %86 = math.erf %85 : vector<2x32xf32>
    %cst_29 = arith.constant 1.000000e+00 : f32
    %87 = vector.broadcast %cst_29 : f32 to vector<2x32xf32>
    %88 = arith.addf %87, %86 : vector<2x32xf32>
    %89 = arith.mulf %83, %88 : vector<2x32xf32>
    %90 = arith.addf %47, %89 : vector<2x32xf32>
    %91 = arith.index_cast %c1_i32 : i32 to index
    %c0_30 = arith.constant 0 : index
    %c0_31 = arith.constant 0 : index
    %92 = vector.load %arg4[%91, %c0_30, %c0_31] : memref<8x2x32xf32, #tpu.memory_space<vmem>>, vector<1x2x32xf32>
    %93 = vector.shape_cast %92 : vector<1x2x32xf32> to vector<2x32xf32>
    %94 = vector.shape_cast %90 : vector<2x32xf32> to vector<1x2x32xf32>
    tpu.vector_store %arg4[%91, %c0_30, %c0_31], %94 {strides = array<i32>} : memref<8x2x32xf32, #tpu.memory_space<vmem>>, vector<1x2x32xf32>,
    %c2_i32 = arith.constant 2 : i32
    %95 = arith.index_cast %c2_i32 : i32 to index
    %c0_32 = arith.constant 0 : index
    %c0_33 = arith.constant 0 : index
    %96 = vector.load %arg1[%95, %c0_32, %c0_33] : memref<8x2x32xf32, #tpu.memory_space<vmem>>, vector<1x2x32xf32>
    %97 = vector.shape_cast %96 : vector<1x2x32xf32> to vector<2x32xf32>
    %cst_34 = arith.constant dense<0.000000e+00> : vector<2x64xf32>
    %98 = tpu.matmul %90, %3, %cst_34 {dimension_numbers = #tpu.dot_dimension_numbers<[1], [0], [0], [1], [0, 0, 1, 1], [], []>} : vector<2x32xf32>, vector<32x64xf32>, vector<2x64xf32> -> vector<2x64xf32>
    %99 = vector.extract_strided_slice %98 {offsets = [0, 0], sizes = [2, 32], strides = [1, 1]} : vector<2x64xf32> to vector<2x32xf32>
    %100 = vector.extract_strided_slice %98 {offsets = [0, 32], sizes = [2, 32], strides = [1, 1]} : vector<2x64xf32> to vector<2x32xf32>
    %101 = arith.addf %99, %6 : vector<2x32xf32>
    %102 = arith.addf %101, %97 : vector<2x32xf32>
    %103 = arith.mulf %100, %54 : vector<2x32xf32>
    %104 = arith.addf %102, %103 : vector<2x32xf32>
    %cst_35 = arith.constant dense<0.000000e+00> : vector<2xf32>
    %105 = vector.multi_reduction <add>, %104, %cst_35 [1] : vector<2x32xf32> to vector<2xf32>
    %106 = vector.shape_cast %105 : vector<2xf32> to vector<2x1xf32>
    %107 = arith.mulf %104, %104 : vector<2x32xf32>
    %cst_36 = arith.constant dense<0.000000e+00> : vector<2xf32>
    %108 = vector.multi_reduction <add>, %107, %cst_36 [1] : vector<2x32xf32> to vector<2xf32>
    %109 = vector.shape_cast %108 : vector<2xf32> to vector<2x1xf32>
    %110 = vector.broadcast %cst : f32 to vector<2x1xf32>
    %111 = arith.mulf %106, %110 : vector<2x1xf32>
    %112 = vector.broadcast %cst : f32 to vector<2x1xf32>
    %113 = arith.mulf %109, %112 : vector<2x1xf32>
    %114 = arith.mulf %111, %111 : vector<2x1xf32>
    %115 = arith.subf %113, %114 : vector<2x1xf32>
    %cst_37 = arith.constant 0.000000e+00 : f32
    %116 = vector.broadcast %cst_37 : f32 to vector<2x1xf32>
    %117 = arith.maximumf %115, %116 : vector<2x1xf32>
    %118 = vector.broadcast %111 : vector<2x1xf32> to vector<2x32xf32>
    %119 = arith.subf %104, %118 : vector<2x32xf32>
    %cst_38 = arith.constant 9.99999974E-6 : f32
    %120 = vector.broadcast %cst_38 : f32 to vector<2x1xf32>
    %121 = arith.addf %117, %120 : vector<2x1xf32>
    %122 = math.rsqrt %121 : vector<2x1xf32>
    %123 = vector.broadcast %122 : vector<2x1xf32> to vector<2x32xf32>
    %124 = arith.mulf %119, %123 : vector<2x32xf32>
    %cst_39 = arith.constant 5.000000e-01 : f32
    %125 = vector.broadcast %cst_39 : f32 to vector<2x32xf32>
    %126 = arith.mulf %125, %124 : vector<2x32xf32>
    %127 = vector.broadcast %cst_8 : f32 to vector<2x32xf32>
    %128 = arith.mulf %124, %127 : vector<2x32xf32>
    %129 = math.erf %128 : vector<2x32xf32>
    %cst_40 = arith.constant 1.000000e+00 : f32
    %130 = vector.broadcast %cst_40 : f32 to vector<2x32xf32>
    %131 = arith.addf %130, %129 : vector<2x32xf32>
    %132 = arith.mulf %126, %131 : vector<2x32xf32>
    %133 = arith.addf %90, %132 : vector<2x32xf32>
    %134 = arith.index_cast %c2_i32 : i32 to index
    %c0_41 = arith.constant 0 : index
    %c0_42 = arith.constant 0 : index
    %135 = vector.load %arg4[%134, %c0_41, %c0_42] : memref<8x2x32xf32, #tpu.memory_space<vmem>>, vector<1x2x32xf32>
    %136 = vector.shape_cast %135 : vector<1x2x32xf32> to vector<2x32xf32>
    %137 = vector.shape_cast %133 : vector<2x32xf32> to vector<1x2x32xf32>
    tpu.vector_store %arg4[%134, %c0_41, %c0_42], %137 {strides = array<i32>} : memref<8x2x32xf32, #tpu.memory_space<vmem>>, vector<1x2x32xf32>,
    %c3_i32 = arith.constant 3 : i32
    %138 = arith.index_cast %c3_i32 : i32 to index
    %c0_43 = arith.constant 0 : index
    %c0_44 = arith.constant 0 : index
    %139 = vector.load %arg1[%138, %c0_43, %c0_44] : memref<8x2x32xf32, #tpu.memory_space<vmem>>, vector<1x2x32xf32>
    %140 = vector.shape_cast %139 : vector<1x2x32xf32> to vector<2x32xf32>
    %cst_45 = arith.constant dense<0.000000e+00> : vector<2x64xf32>
    %141 = tpu.matmul %133, %3, %cst_45 {dimension_numbers = #tpu.dot_dimension_numbers<[1], [0], [0], [1], [0, 0, 1, 1], [], []>} : vector<2x32xf32>, vector<32x64xf32>, vector<2x64xf32> -> vector<2x64xf32>
    %142 = vector.extract_strided_slice %141 {offsets = [0, 0], sizes = [2, 32], strides = [1, 1]} : vector<2x64xf32> to vector<2x32xf32>
    %143 = vector.extract_strided_slice %141 {offsets = [0, 32], sizes = [2, 32], strides = [1, 1]} : vector<2x64xf32> to vector<2x32xf32>
    %144 = arith.addf %142, %6 : vector<2x32xf32>
    %145 = arith.addf %144, %140 : vector<2x32xf32>
    %146 = arith.mulf %143, %97 : vector<2x32xf32>
    %147 = arith.addf %145, %146 : vector<2x32xf32>
    %cst_46 = arith.constant dense<0.000000e+00> : vector<2xf32>
    %148 = vector.multi_reduction <add>, %147, %cst_46 [1] : vector<2x32xf32> to vector<2xf32>
    %149 = vector.shape_cast %148 : vector<2xf32> to vector<2x1xf32>
    %150 = arith.mulf %147, %147 : vector<2x32xf32>
    %cst_47 = arith.constant dense<0.000000e+00> : vector<2xf32>
    %151 = vector.multi_reduction <add>, %150, %cst_47 [1] : vector<2x32xf32> to vector<2xf32>
    %152 = vector.shape_cast %151 : vector<2xf32> to vector<2x1xf32>
    %153 = vector.broadcast %cst : f32 to vector<2x1xf32>
    %154 = arith.mulf %149, %153 : vector<2x1xf32>
    %155 = vector.broadcast %cst : f32 to vector<2x1xf32>
    %156 = arith.mulf %152, %155 : vector<2x1xf32>
    %157 = arith.mulf %154, %154 : vector<2x1xf32>
    %158 = arith.subf %156, %157 : vector<2x1xf32>
    %cst_48 = arith.constant 0.000000e+00 : f32
    %159 = vector.broadcast %cst_48 : f32 to vector<2x1xf32>
    %160 = arith.maximumf %158, %159 : vector<2x1xf32>
    %161 = vector.broadcast %154 : vector<2x1xf32> to vector<2x32xf32>
    %162 = arith.subf %147, %161 : vector<2x32xf32>
    %cst_49 = arith.constant 9.99999974E-6 : f32
    %163 = vector.broadcast %cst_49 : f32 to vector<2x1xf32>
    %164 = arith.addf %160, %163 : vector<2x1xf32>
    %165 = math.rsqrt %164 : vector<2x1xf32>
    %166 = vector.broadcast %165 : vector<2x1xf32> to vector<2x32xf32>
    %167 = arith.mulf %162, %166 : vector<2x32xf32>
    %cst_50 = arith.constant 5.000000e-01 : f32
    %168 = vector.broadcast %cst_50 : f32 to vector<2x32xf32>
    %169 = arith.mulf %168, %167 : vector<2x32xf32>
    %170 = vector.broadcast %cst_8 : f32 to vector<2x32xf32>
    %171 = arith.mulf %167, %170 : vector<2x32xf32>
    %172 = math.erf %171 : vector<2x32xf32>
    %cst_51 = arith.constant 1.000000e+00 : f32
    %173 = vector.broadcast %cst_51 : f32 to vector<2x32xf32>
    %174 = arith.addf %173, %172 : vector<2x32xf32>
    %175 = arith.mulf %169, %174 : vector<2x32xf32>
    %176 = arith.addf %133, %175 : vector<2x32xf32>
    %177 = arith.index_cast %c3_i32 : i32 to index
    %c0_52 = arith.constant 0 : index
    %c0_53 = arith.constant 0 : index
    %178 = vector.load %arg4[%177, %c0_52, %c0_53] : memref<8x2x32xf32, #tpu.memory_space<vmem>>, vector<1x2x32xf32>
    %179 = vector.shape_cast %178 : vector<1x2x32xf32> to vector<2x32xf32>
    %180 = vector.shape_cast %176 : vector<2x32xf32> to vector<1x2x32xf32>
    tpu.vector_store %arg4[%177, %c0_52, %c0_53], %180 {strides = array<i32>} : memref<8x2x32xf32, #tpu.memory_space<vmem>>, vector<1x2x32xf32>,
    %c4_i32 = arith.constant 4 : i32
    %181 = arith.index_cast %c4_i32 : i32 to index
    %c0_54 = arith.constant 0 : index
    %c0_55 = arith.constant 0 : index
    %182 = vector.load %arg1[%181, %c0_54, %c0_55] : memref<8x2x32xf32, #tpu.memory_space<vmem>>, vector<1x2x32xf32>
    %183 = vector.shape_cast %182 : vector<1x2x32xf32> to vector<2x32xf32>
    %cst_56 = arith.constant dense<0.000000e+00> : vector<2x64xf32>
    %184 = tpu.matmul %176, %3, %cst_56 {dimension_numbers = #tpu.dot_dimension_numbers<[1], [0], [0], [1], [0, 0, 1, 1], [], []>} : vector<2x32xf32>, vector<32x64xf32>, vector<2x64xf32> -> vector<2x64xf32>
    %185 = vector.extract_strided_slice %184 {offsets = [0, 0], sizes = [2, 32], strides = [1, 1]} : vector<2x64xf32> to vector<2x32xf32>
    %186 = vector.extract_strided_slice %184 {offsets = [0, 32], sizes = [2, 32], strides = [1, 1]} : vector<2x64xf32> to vector<2x32xf32>
    %187 = arith.addf %185, %6 : vector<2x32xf32>
    %188 = arith.addf %187, %183 : vector<2x32xf32>
    %189 = arith.mulf %186, %140 : vector<2x32xf32>
    %190 = arith.addf %188, %189 : vector<2x32xf32>
    %cst_57 = arith.constant dense<0.000000e+00> : vector<2xf32>
    %191 = vector.multi_reduction <add>, %190, %cst_57 [1] : vector<2x32xf32> to vector<2xf32>
    %192 = vector.shape_cast %191 : vector<2xf32> to vector<2x1xf32>
    %193 = arith.mulf %190, %190 : vector<2x32xf32>
    %cst_58 = arith.constant dense<0.000000e+00> : vector<2xf32>
    %194 = vector.multi_reduction <add>, %193, %cst_58 [1] : vector<2x32xf32> to vector<2xf32>
    %195 = vector.shape_cast %194 : vector<2xf32> to vector<2x1xf32>
    %196 = vector.broadcast %cst : f32 to vector<2x1xf32>
    %197 = arith.mulf %192, %196 : vector<2x1xf32>
    %198 = vector.broadcast %cst : f32 to vector<2x1xf32>
    %199 = arith.mulf %195, %198 : vector<2x1xf32>
    %200 = arith.mulf %197, %197 : vector<2x1xf32>
    %201 = arith.subf %199, %200 : vector<2x1xf32>
    %cst_59 = arith.constant 0.000000e+00 : f32
    %202 = vector.broadcast %cst_59 : f32 to vector<2x1xf32>
    %203 = arith.maximumf %201, %202 : vector<2x1xf32>
    %204 = vector.broadcast %197 : vector<2x1xf32> to vector<2x32xf32>
    %205 = arith.subf %190, %204 : vector<2x32xf32>
    %cst_60 = arith.constant 9.99999974E-6 : f32
    %206 = vector.broadcast %cst_60 : f32 to vector<2x1xf32>
    %207 = arith.addf %203, %206 : vector<2x1xf32>
    %208 = math.rsqrt %207 : vector<2x1xf32>
    %209 = vector.broadcast %208 : vector<2x1xf32> to vector<2x32xf32>
    %210 = arith.mulf %205, %209 : vector<2x32xf32>
    %cst_61 = arith.constant 5.000000e-01 : f32
    %211 = vector.broadcast %cst_61 : f32 to vector<2x32xf32>
    %212 = arith.mulf %211, %210 : vector<2x32xf32>
    %213 = vector.broadcast %cst_8 : f32 to vector<2x32xf32>
    %214 = arith.mulf %210, %213 : vector<2x32xf32>
    %215 = math.erf %214 : vector<2x32xf32>
    %cst_62 = arith.constant 1.000000e+00 : f32
    %216 = vector.broadcast %cst_62 : f32 to vector<2x32xf32>
    %217 = arith.addf %216, %215 : vector<2x32xf32>
    %218 = arith.mulf %212, %217 : vector<2x32xf32>
    %219 = arith.addf %176, %218 : vector<2x32xf32>
    %220 = arith.index_cast %c4_i32 : i32 to index
    %c0_63 = arith.constant 0 : index
    %c0_64 = arith.constant 0 : index
    %221 = vector.load %arg4[%220, %c0_63, %c0_64] : memref<8x2x32xf32, #tpu.memory_space<vmem>>, vector<1x2x32xf32>
    %222 = vector.shape_cast %221 : vector<1x2x32xf32> to vector<2x32xf32>
    %223 = vector.shape_cast %219 : vector<2x32xf32> to vector<1x2x32xf32>
    tpu.vector_store %arg4[%220, %c0_63, %c0_64], %223 {strides = array<i32>} : memref<8x2x32xf32, #tpu.memory_space<vmem>>, vector<1x2x32xf32>,
    %c5_i32 = arith.constant 5 : i32
    %224 = arith.index_cast %c5_i32 : i32 to index
    %c0_65 = arith.constant 0 : index
    %c0_66 = arith.constant 0 : index
    %225 = vector.load %arg1[%224, %c0_65, %c0_66] : memref<8x2x32xf32, #tpu.memory_space<vmem>>, vector<1x2x32xf32>
    %226 = vector.shape_cast %225 : vector<1x2x32xf32> to vector<2x32xf32>
    %cst_67 = arith.constant dense<0.000000e+00> : vector<2x64xf32>
    %227 = tpu.matmul %219, %3, %cst_67 {dimension_numbers = #tpu.dot_dimension_numbers<[1], [0], [0], [1], [0, 0, 1, 1], [], []>} : vector<2x32xf32>, vector<32x64xf32>, vector<2x64xf32> -> vector<2x64xf32>
    %228 = vector.extract_strided_slice %227 {offsets = [0, 0], sizes = [2, 32], strides = [1, 1]} : vector<2x64xf32> to vector<2x32xf32>
    %229 = vector.extract_strided_slice %227 {offsets = [0, 32], sizes = [2, 32], strides = [1, 1]} : vector<2x64xf32> to vector<2x32xf32>
    %230 = arith.addf %228, %6 : vector<2x32xf32>
    %231 = arith.addf %230, %226 : vector<2x32xf32>
    %232 = arith.mulf %229, %183 : vector<2x32xf32>
    %233 = arith.addf %231, %232 : vector<2x32xf32>
    %cst_68 = arith.constant dense<0.000000e+00> : vector<2xf32>
    %234 = vector.multi_reduction <add>, %233, %cst_68 [1] : vector<2x32xf32> to vector<2xf32>
    %235 = vector.shape_cast %234 : vector<2xf32> to vector<2x1xf32>
    %236 = arith.mulf %233, %233 : vector<2x32xf32>
    %cst_69 = arith.constant dense<0.000000e+00> : vector<2xf32>
    %237 = vector.multi_reduction <add>, %236, %cst_69 [1] : vector<2x32xf32> to vector<2xf32>
    %238 = vector.shape_cast %237 : vector<2xf32> to vector<2x1xf32>
    %239 = vector.broadcast %cst : f32 to vector<2x1xf32>
    %240 = arith.mulf %235, %239 : vector<2x1xf32>
    %241 = vector.broadcast %cst : f32 to vector<2x1xf32>
    %242 = arith.mulf %238, %241 : vector<2x1xf32>
    %243 = arith.mulf %240, %240 : vector<2x1xf32>
    %244 = arith.subf %242, %243 : vector<2x1xf32>
    %cst_70 = arith.constant 0.000000e+00 : f32
    %245 = vector.broadcast %cst_70 : f32 to vector<2x1xf32>
    %246 = arith.maximumf %244, %245 : vector<2x1xf32>
    %247 = vector.broadcast %240 : vector<2x1xf32> to vector<2x32xf32>
    %248 = arith.subf %233, %247 : vector<2x32xf32>
    %cst_71 = arith.constant 9.99999974E-6 : f32
    %249 = vector.broadcast %cst_71 : f32 to vector<2x1xf32>
    %250 = arith.addf %246, %249 : vector<2x1xf32>
    %251 = math.rsqrt %250 : vector<2x1xf32>
    %252 = vector.broadcast %251 : vector<2x1xf32> to vector<2x32xf32>
    %253 = arith.mulf %248, %252 : vector<2x32xf32>
    %cst_72 = arith.constant 5.000000e-01 : f32
    %254 = vector.broadcast %cst_72 : f32 to vector<2x32xf32>
    %255 = arith.mulf %254, %253 : vector<2x32xf32>
    %256 = vector.broadcast %cst_8 : f32 to vector<2x32xf32>
    %257 = arith.mulf %253, %256 : vector<2x32xf32>
    %258 = math.erf %257 : vector<2x32xf32>
    %cst_73 = arith.constant 1.000000e+00 : f32
    %259 = vector.broadcast %cst_73 : f32 to vector<2x32xf32>
    %260 = arith.addf %259, %258 : vector<2x32xf32>
    %261 = arith.mulf %255, %260 : vector<2x32xf32>
    %262 = arith.addf %219, %261 : vector<2x32xf32>
    %263 = arith.index_cast %c5_i32 : i32 to index
    %c0_74 = arith.constant 0 : index
    %c0_75 = arith.constant 0 : index
    %264 = vector.load %arg4[%263, %c0_74, %c0_75] : memref<8x2x32xf32, #tpu.memory_space<vmem>>, vector<1x2x32xf32>
    %265 = vector.shape_cast %264 : vector<1x2x32xf32> to vector<2x32xf32>
    %266 = vector.shape_cast %262 : vector<2x32xf32> to vector<1x2x32xf32>
    tpu.vector_store %arg4[%263, %c0_74, %c0_75], %266 {strides = array<i32>} : memref<8x2x32xf32, #tpu.memory_space<vmem>>, vector<1x2x32xf32>,
    %c6_i32 = arith.constant 6 : i32
    %267 = arith.index_cast %c6_i32 : i32 to index
    %c0_76 = arith.constant 0 : index
    %c0_77 = arith.constant 0 : index
    %268 = vector.load %arg1[%267, %c0_76, %c0_77] : memref<8x2x32xf32, #tpu.memory_space<vmem>>, vector<1x2x32xf32>
    %269 = vector.shape_cast %268 : vector<1x2x32xf32> to vector<2x32xf32>
    %cst_78 = arith.constant dense<0.000000e+00> : vector<2x64xf32>
    %270 = tpu.matmul %262, %3, %cst_78 {dimension_numbers = #tpu.dot_dimension_numbers<[1], [0], [0], [1], [0, 0, 1, 1], [], []>} : vector<2x32xf32>, vector<32x64xf32>, vector<2x64xf32> -> vector<2x64xf32>
    %271 = vector.extract_strided_slice %270 {offsets = [0, 0], sizes = [2, 32], strides = [1, 1]} : vector<2x64xf32> to vector<2x32xf32>
    %272 = vector.extract_strided_slice %270 {offsets = [0, 32], sizes = [2, 32], strides = [1, 1]} : vector<2x64xf32> to vector<2x32xf32>
    %273 = arith.addf %271, %6 : vector<2x32xf32>
    %274 = arith.addf %273, %269 : vector<2x32xf32>
    %275 = arith.mulf %272, %226 : vector<2x32xf32>
    %276 = arith.addf %274, %275 : vector<2x32xf32>
    %cst_79 = arith.constant dense<0.000000e+00> : vector<2xf32>
    %277 = vector.multi_reduction <add>, %276, %cst_79 [1] : vector<2x32xf32> to vector<2xf32>
    %278 = vector.shape_cast %277 : vector<2xf32> to vector<2x1xf32>
    %279 = arith.mulf %276, %276 : vector<2x32xf32>
    %cst_80 = arith.constant dense<0.000000e+00> : vector<2xf32>
    %280 = vector.multi_reduction <add>, %279, %cst_80 [1] : vector<2x32xf32> to vector<2xf32>
    %281 = vector.shape_cast %280 : vector<2xf32> to vector<2x1xf32>
    %282 = vector.broadcast %cst : f32 to vector<2x1xf32>
    %283 = arith.mulf %278, %282 : vector<2x1xf32>
    %284 = vector.broadcast %cst : f32 to vector<2x1xf32>
    %285 = arith.mulf %281, %284 : vector<2x1xf32>
    %286 = arith.mulf %283, %283 : vector<2x1xf32>
    %287 = arith.subf %285, %286 : vector<2x1xf32>
    %cst_81 = arith.constant 0.000000e+00 : f32
    %288 = vector.broadcast %cst_81 : f32 to vector<2x1xf32>
    %289 = arith.maximumf %287, %288 : vector<2x1xf32>
    %290 = vector.broadcast %283 : vector<2x1xf32> to vector<2x32xf32>
    %291 = arith.subf %276, %290 : vector<2x32xf32>
    %cst_82 = arith.constant 9.99999974E-6 : f32
    %292 = vector.broadcast %cst_82 : f32 to vector<2x1xf32>
    %293 = arith.addf %289, %292 : vector<2x1xf32>
    %294 = math.rsqrt %293 : vector<2x1xf32>
    %295 = vector.broadcast %294 : vector<2x1xf32> to vector<2x32xf32>
    %296 = arith.mulf %291, %295 : vector<2x32xf32>
    %cst_83 = arith.constant 5.000000e-01 : f32
    %297 = vector.broadcast %cst_83 : f32 to vector<2x32xf32>
    %298 = arith.mulf %297, %296 : vector<2x32xf32>
    %299 = vector.broadcast %cst_8 : f32 to vector<2x32xf32>
    %300 = arith.mulf %296, %299 : vector<2x32xf32>
    %301 = math.erf %300 : vector<2x32xf32>
    %cst_84 = arith.constant 1.000000e+00 : f32
    %302 = vector.broadcast %cst_84 : f32 to vector<2x32xf32>
    %303 = arith.addf %302, %301 : vector<2x32xf32>
    %304 = arith.mulf %298, %303 : vector<2x32xf32>
    %305 = arith.addf %262, %304 : vector<2x32xf32>
    %306 = arith.index_cast %c6_i32 : i32 to index
    %c0_85 = arith.constant 0 : index
    %c0_86 = arith.constant 0 : index
    %307 = vector.load %arg4[%306, %c0_85, %c0_86] : memref<8x2x32xf32, #tpu.memory_space<vmem>>, vector<1x2x32xf32>
    %308 = vector.shape_cast %307 : vector<1x2x32xf32> to vector<2x32xf32>
    %309 = vector.shape_cast %305 : vector<2x32xf32> to vector<1x2x32xf32>
    tpu.vector_store %arg4[%306, %c0_85, %c0_86], %309 {strides = array<i32>} : memref<8x2x32xf32, #tpu.memory_space<vmem>>, vector<1x2x32xf32>,
    %c7_i32 = arith.constant 7 : i32
    %310 = arith.index_cast %c7_i32 : i32 to index
    %c0_87 = arith.constant 0 : index
    %c0_88 = arith.constant 0 : index
    %311 = vector.load %arg1[%310, %c0_87, %c0_88] : memref<8x2x32xf32, #tpu.memory_space<vmem>>, vector<1x2x32xf32>
    %312 = vector.shape_cast %311 : vector<1x2x32xf32> to vector<2x32xf32>
    %cst_89 = arith.constant dense<0.000000e+00> : vector<2x64xf32>
    %313 = tpu.matmul %305, %3, %cst_89 {dimension_numbers = #tpu.dot_dimension_numbers<[1], [0], [0], [1], [0, 0, 1, 1], [], []>} : vector<2x32xf32>, vector<32x64xf32>, vector<2x64xf32> -> vector<2x64xf32>
    %314 = vector.extract_strided_slice %313 {offsets = [0, 0], sizes = [2, 32], strides = [1, 1]} : vector<2x64xf32> to vector<2x32xf32>
    %315 = vector.extract_strided_slice %313 {offsets = [0, 32], sizes = [2, 32], strides = [1, 1]} : vector<2x64xf32> to vector<2x32xf32>
    %316 = arith.addf %314, %6 : vector<2x32xf32>
    %317 = arith.addf %316, %312 : vector<2x32xf32>
    %318 = arith.mulf %315, %269 : vector<2x32xf32>
    %319 = arith.addf %317, %318 : vector<2x32xf32>
    %cst_90 = arith.constant dense<0.000000e+00> : vector<2xf32>
    %320 = vector.multi_reduction <add>, %319, %cst_90 [1] : vector<2x32xf32> to vector<2xf32>
    %321 = vector.shape_cast %320 : vector<2xf32> to vector<2x1xf32>
    %322 = arith.mulf %319, %319 : vector<2x32xf32>
    %cst_91 = arith.constant dense<0.000000e+00> : vector<2xf32>
    %323 = vector.multi_reduction <add>, %322, %cst_91 [1] : vector<2x32xf32> to vector<2xf32>
    %324 = vector.shape_cast %323 : vector<2xf32> to vector<2x1xf32>
    %325 = vector.broadcast %cst : f32 to vector<2x1xf32>
    %326 = arith.mulf %321, %325 : vector<2x1xf32>
    %327 = vector.broadcast %cst : f32 to vector<2x1xf32>
    %328 = arith.mulf %324, %327 : vector<2x1xf32>
    %329 = arith.mulf %326, %326 : vector<2x1xf32>
    %330 = arith.subf %328, %329 : vector<2x1xf32>
    %cst_92 = arith.constant 0.000000e+00 : f32
    %331 = vector.broadcast %cst_92 : f32 to vector<2x1xf32>
    %332 = arith.maximumf %330, %331 : vector<2x1xf32>
    %333 = vector.broadcast %326 : vector<2x1xf32> to vector<2x32xf32>
    %334 = arith.subf %319, %333 : vector<2x32xf32>
    %cst_93 = arith.constant 9.99999974E-6 : f32
    %335 = vector.broadcast %cst_93 : f32 to vector<2x1xf32>
    %336 = arith.addf %332, %335 : vector<2x1xf32>
    %337 = math.rsqrt %336 : vector<2x1xf32>
    %338 = vector.broadcast %337 : vector<2x1xf32> to vector<2x32xf32>
    %339 = arith.mulf %334, %338 : vector<2x32xf32>
    %cst_94 = arith.constant 5.000000e-01 : f32
    %340 = vector.broadcast %cst_94 : f32 to vector<2x32xf32>
    %341 = arith.mulf %340, %339 : vector<2x32xf32>
    %342 = vector.broadcast %cst_8 : f32 to vector<2x32xf32>
    %343 = arith.mulf %339, %342 : vector<2x32xf32>
    %344 = math.erf %343 : vector<2x32xf32>
    %cst_95 = arith.constant 1.000000e+00 : f32
    %345 = vector.broadcast %cst_95 : f32 to vector<2x32xf32>
    %346 = arith.addf %345, %344 : vector<2x32xf32>
    %347 = arith.mulf %341, %346 : vector<2x32xf32>
    %348 = arith.addf %305, %347 : vector<2x32xf32>
    %349 = arith.index_cast %c7_i32 : i32 to index
    %c0_96 = arith.constant 0 : index
    %c0_97 = arith.constant 0 : index
    %350 = vector.load %arg4[%349, %c0_96, %c0_97] : memref<8x2x32xf32, #tpu.memory_space<vmem>>, vector<1x2x32xf32>
    %351 = vector.shape_cast %350 : vector<1x2x32xf32> to vector<2x32xf32>
    %352 = vector.shape_cast %348 : vector<2x32xf32> to vector<1x2x32xf32>
    tpu.vector_store %arg4[%349, %c0_96, %c0_97], %352 {strides = array<i32>} : memref<8x2x32xf32, #tpu.memory_space<vmem>>, vector<1x2x32xf32>,
    %c8_i32 = arith.constant 8 : i32
    %c0_98 = arith.constant 0 : index
    %c0_99 = arith.constant 0 : index
    %353 = vector.load %arg5[%c0_98, %c0_99] : memref<2x32xf32, #tpu.memory_space<vmem>>, vector<2x32xf32>
    tpu.vector_store %arg5[%c0_98, %c0_99], %348 {strides = array<i32>} : memref<2x32xf32, #tpu.memory_space<vmem>>, vector<2x32xf32>,
    %c0_100 = arith.constant 0 : index
    %c0_101 = arith.constant 0 : index
    %354 = vector.load %arg6[%c0_100, %c0_101] : memref<2x32xf32, #tpu.memory_space<vmem>>, vector<2x32xf32>
    tpu.vector_store %arg6[%c0_100, %c0_101], %312 {strides = array<i32>} : memref<2x32xf32, #tpu.memory_space<vmem>>, vector<2x32xf32>,
    return
  }
  func.func @transform_0(%arg0: i32) -> (i32, i32, i32) {
    %c0_i32 = arith.constant 0 : i32
    %c0_i32_0 = arith.constant 0 : i32
    %c0_i32_1 = arith.constant 0 : i32
    return %arg0, %c0_i32, %c0_i32_0 : i32, i32, i32
  }
  func.func @transform_1(%arg0: i32) -> (i32, i32) {
    %c0_i32 = arith.constant 0 : i32
    %c0_i32_0 = arith.constant 0 : i32
    %c0_i32_1 = arith.constant 0 : i32
    return %c0_i32, %c0_i32_0 : i32, i32
  }
  func.func @transform_2(%arg0: i32) -> (i32, i32) {
    %c0_i32 = arith.constant 0 : i32
    %c0_i32_0 = arith.constant 0 : i32
    %c0_i32_1 = arith.constant 0 : i32
    return %c0_i32, %c0_i32_0 : i32, i32
  }
  func.func @transform_3(%arg0: i32) -> (i32, i32, i32) {
    %c0_i32 = arith.constant 0 : i32
    %c0_i32_0 = arith.constant 0 : i32
    %c0_i32_1 = arith.constant 0 : i32
    return %arg0, %c0_i32, %c0_i32_0 : i32, i32, i32
  }
}

</mosaic_0001>

<bundles_post_ra>
// kernel: _lambda_.1
= control target key start
LH: loop header
LB: loop body
LE: loop exit
PB: predicated region body
PF: predicated region fallthrough
CT: control target
= control target key end

     0   :  { %vm18_vm0 = vcmask 254976   ;;  %v1164_v0 = vmov 0.0|0.0   ;;  %vm1165_vm1 = vmmov 0   ;;  %v1166_v4 = vmov 0.0   ;;  %s1168_s24 = smov 96   ;;  %s1368_s1 = inlined_call_operand.vmem [shape: f32[32,64], index: 1, kind: input, shape index: {}]   ;;  %s1369_s2 = inlined_call_operand.vmem [shape: f32[1,32], index: 2, kind: input, shape index: {}]   ;;  %s1370_s0 = inlined_call_operand.vmem [shape: f32[8,2,32], index: 0, kind: input, shape index: {}]   ;;  %s1371_s3 = inlined_call_operand.vmem [shape: f32[8,2,32], index: 3, kind: output, shape index: {}]  }
   0x1   :  { %1079 = vmatprep.subr.bf16.mxu0 %v1164_v0  ;;  %v21_v1 = vld [vmem:[%s1368_s1] sm:$0xff]  ;;  %v22_v2 = vld [vmem:[%s1368_s1 + $0x8] sm:$0xff]  ;;  %v23_v3 = vld [vmem:[%s1368_s1 + $0x10] sm:$0xff]  ;;  %999 = vmatprep.mubr.msk.f32.mxu0 %vm1165_vm1, %v1166_v4  ;;  %19 = vst.msk [vmem:[#allocation2] sm:$0x3] %vm18_vm0, %v1166_v4  ;;  %vm35_vm2 = vcmask 261120  }
   0x2   :  { %20 = vst.msk [vmem:[#allocation3] sm:$0x3] %vm18_vm0, %v1166_v4  ;;  %v1205_v5 = vpack.c.bf16 %v22_v2, %v21_v1  ;;  %v24_v6 = vld [vmem:[%s1368_s1 + $0x18] sm:$0xff]  ;;  %1085 = vmatprep.subr.bf16.mxu1 %v1164_v0  ;;  %1010 = vmatprep.mubr.msk.f32.mxu1 %vm1165_vm1, %v1166_v4  ;;  %s1167_s1 = smov 32   ;;  %v1234_v11 = vld [vmem:[%s1369_s2] ss:$0 sm:$0xff] }
   0x3   :  { %v1214_v7 = vpack.c.bf16 %v24_v6, %v23_v3  ;;  %v34_v13 = vld [vmem:[%s1370_s0] sm:$0x3]  ;;  %v930_v45 = vld [vmem:[%s1370_s0 + $0x2] sm:$0x3] }
   0x4   :  { %1081 = vmatpush3.bf16.msra.mxu0 %v1205_v5  ;;  %1087 = vmatpush3.bf16.msra.mxu1 %v1205_v5 }
   0x5   :  { %1082 = vmatprep.subr.bf16.mxu0 %v1164_v0  ;;  %1088 = vmatprep.subr.bf16.mxu1 %v1164_v0 }
   0x8   :  { %1084 = vmatpush3.bf16.msra.mxu0 %v1214_v7  ;;  %v32_v8 = vld [vmem:[#allocation2] sm:$0x3]  ;;  %1090 = vmatpush3.bf16.msra.mxu1 %v1214_v7 }
   0x9   :  { %v33_v9 = vld [vmem:[#allocation3] sm:$0x3]  ;;  %1091 = vmatprep.subr.bf16.mxu0 %v1164_v0  ;;  %1097 = vmatprep.subr.bf16.mxu1 %v1164_v0 }
   0xa   :  { %112 = vrot.lane.b32.xlu0 %v33_v9, %s1167_s1 }
   0xb   :  { %1000 = vmatmul.mubr.msk.f32.vlgmr.msra.gmra.mrb[0].mxu0 %vm35_vm2, %v32_v8 }
   0xc   :  { %1093 = vmatpush3.bf16.msra.mxu0 %v1205_v5  ;;  %1021 = vmatprep.mubr.msk.f32.mxu0 %vm1165_vm1, %v1166_v4 }
   0xd   :  { %1094 = vmatprep.subr.bf16.mxu0 %v1164_v0 }
  0x10   :  { %1096 = vmatpush3.bf16.msra.mxu0 %v1214_v7 }
  0x11   :  { %1103 = vmatprep.subr.bf16.mxu0 %v1164_v0 }
  0x7c   :  { %v113_v10 = vpop.permute.xlu0 %112 }
  0xde   :  { %v105_v12 = vpop.f32.mrb[0].mxu0 }
  0xdf   :  { %v109_v14 = vadd.f32 %v1234_v11, %v105_v12  ;;  %v115_v15 = vmul.f32 %v113_v10, %v105_v12  ;;  %v1001_v16 = vpop.f32.mrb[1].mxu0 }
  0xe1   :  { %117 = vrot.lane.b32.xlu0 %v115_v15, %s1168_s24  ;;  %v110_v17 = vadd.f32 %v109_v14, %v34_v13  ;;  %v933_v15 = vld [vmem:[%s1370_s0 + $0x4] sm:$0x3] }
  0xe5   :  { %223 = vrot.lane.b32.xlu0 %v34_v13, %s1167_s1 }
 0x153   :  { %v118_v18 = vpop.permute.xlu0 %117 }
 0x154   :  { %v120_v19 = vadd.f32 %v118_v18, %v110_v17 }
 0x156   :  { %v122_v20 = vsel %vm18_vm0, %v120_v19, 0.0  ;;  %v125_v21 = vmul.f32 %v120_v19, %v120_v19 }
 0x157   :  { %123 = vadd.xlane.f32.xlu1 %v122_v20  ;;  %v224_v40 = vpop.permute.xlu0 %223 }
 0x158   :  { %v126_v22 = vsel %vm18_vm0, %v125_v21, 0.0 }
 0x15b   :  { %127 = vadd.xlane.f32.xlu1 %v126_v22 }
 0x1e4   :  { %v124_v23 = vpop.xlane.xlu1 %123 }
 0x1e5   :  { %v129_v24 = vmul.f32 0.03125, %v124_v23 }
 0x1e7   :  { %v131_v26 = vmul.f32 %v129_v24, %v129_v24  ;;  %v134_v31 = vsub.f32 %v120_v19, %v129_v24 }
 0x1e8   :  { %v128_v25 = vpop.xlane.xlu1 %127 }
 0x1e9   :  { %v130_v27 = vmul.f32 0.03125, %v128_v25 }
 0x1eb   :  { %v132_v28 = vsub.f32 %v130_v27, %v131_v26 }
 0x1ed   :  { %v133_v29 = vmax.f32 %v132_v28, 0.0 }
 0x1ef   :  { %v135_v30 = vadd.f32 1e-05, %v133_v29 }
 0x1f1   :  { %1132 = vrsqrt.f32 %v135_v30 }
 0x1fb   :  { %v1133_v32 = vpop.eup %1132 }
 0x1fc   :  { %v137_v33 = vmul.f32 %v1133_v32, %v134_v31 }
 0x1fe   :  { %v139_v34 = vmul.f32 0.70710677, %v137_v33  ;;  %v138_v36 = vmul.f32 0.5, %v137_v33 }
 0x200   :  { %1134 = verf.f32 %v139_v34 }
 0x20a   :  { %v1135_v35 = vpop.eup %1134 }
 0x20b   :  { %v141_v37 = vadd.f32 1.0, %v1135_v35 }
 0x20d   :  { %v142_v38 = vmul.f32 %v141_v37, %v138_v36 }
 0x20f   :  { %v143_v39 = vadd.f32 %v142_v38, %v32_v8 }
 0x211   :  { %144 = vst.msk [vmem:[%s1371_s3] sm:$0x3] %vm18_vm0, %v143_v39  ;;  %1011 = vmatmul.mubr.msk.f32.vlgmr.msra.gmra.mrb[0].mxu1 %vm35_vm2, %v143_v39 }
 0x212   :  { %1099 = vmatpush3.bf16.msra.mxu1 %v1205_v5  ;;  %1032 = vmatprep.mubr.msk.f32.mxu1 %vm1165_vm1, %v1166_v4 }
 0x213   :  { %1100 = vmatprep.subr.bf16.mxu1 %v1164_v0 }
 0x216   :  { %1102 = vmatpush3.bf16.msra.mxu1 %v1214_v7 }
 0x217   :  { %1109 = vmatprep.subr.bf16.mxu1 %v1164_v0 }
 0x2e4   :  { %v216_v41 = vpop.f32.mrb[0].mxu1 }
 0x2e5   :  { %v226_v42 = vmul.f32 %v224_v40, %v216_v41  ;;  %v1012_v43 = vpop.f32.mrb[1].mxu1  ;;  %v220_v44 = vadd.f32 %v1234_v11, %v216_v41 }
 0x2e7   :  { %228 = vrot.lane.b32.xlu1 %v226_v42, %s1168_s24  ;;  %v221_v46 = vadd.f32 %v930_v45, %v220_v44  ;;  %v936_v44 = vld [vmem:[%s1370_s0 + $0x6] sm:$0x3] }
 0x359   :  { %v229_v47 = vpop.permute.xlu1 %228 }
 0x35a   :  { %v231_v48 = vadd.f32 %v229_v47, %v221_v46 }
 0x35c   :  { %v232_v49 = vsel %vm18_vm0, %v231_v48, 0.0  ;;  %v235_v50 = vmul.f32 %v231_v48, %v231_v48 }
 0x35d   :  { %233 = vadd.xlane.f32.xlu0 %v232_v49 }
 0x35e   :  { %v236_v51 = vsel %vm18_vm0, %v235_v50, 0.0 }
 0x35f   :  { %237 = vadd.xlane.f32.xlu1 %v236_v51 }
 0x373   :  { %334 = vrot.lane.b32.xlu0 %v930_v45, %s1167_s1 }
 0x3ea   :  { %v234_v52 = vpop.xlane.xlu0 %233 }
 0x3eb   :  { %v239_v53 = vmul.f32 0.03125, %v234_v52 }
 0x3ec   :  { %v238_v54 = vpop.xlane.xlu1 %237 }
 0x3ed   :  { %v241_v55 = vmul.f32 %v239_v53, %v239_v53  ;;  %v240_v56 = vmul.f32 0.03125, %v238_v54  ;;  %v244_v60 = vsub.f32 %v231_v48, %v239_v53 }
 0x3ee   :  { %v335_v9 = vpop.permute.xlu0 %334 }
 0x3ef   :  { %v242_v57 = vsub.f32 %v240_v56, %v241_v55 }
 0x3f1   :  { %v243_v58 = vmax.f32 %v242_v57, 0.0 }
 0x3f3   :  { %v245_v59 = vadd.f32 1e-05, %v243_v58 }
 0x3f5   :  { %1136 = vrsqrt.f32 %v245_v59 }
 0x3ff   :  { %v1137_v61 = vpop.eup %1136 }
 0x400   :  { %v247_v62 = vmul.f32 %v1137_v61, %v244_v60 }
 0x402   :  { %v249_v63 = vmul.f32 0.70710677, %v247_v62  ;;  %v248_v2 = vmul.f32 0.5, %v247_v62 }
 0x404   :  { %1138 = verf.f32 %v249_v63 }
 0x40e   :  { %v1139_v1 = vpop.eup %1138 }
 0x40f   :  { %v251_v3 = vadd.f32 1.0, %v1139_v1 }
 0x411   :  { %v252_v6 = vmul.f32 %v251_v3, %v248_v2 }
 0x413   :  { %v253_v8 = vadd.f32 %v252_v6, %v143_v39 }
 0x415   :  { %932 = vst.msk [vmem:[%s1371_s3 + $0x2] sm:$0x3] %vm18_vm0, %v253_v8  ;;  %1022 = vmatmul.mubr.msk.f32.vlgmr.msra.gmra.mrb[2].mxu0 %vm35_vm2, %v253_v8 }
 0x416   :  { %1105 = vmatpush3.bf16.msra.mxu0 %v1205_v5  ;;  %1043 = vmatprep.mubr.msk.f32.mxu0 %vm1165_vm1, %v1166_v4 }
 0x417   :  { %1106 = vmatprep.subr.bf16.mxu0 %v1164_v0 }
 0x41a   :  { %1108 = vmatpush3.bf16.msra.mxu0 %v1214_v7 }
 0x41b   :  { %1115 = vmatprep.subr.bf16.mxu0 %v1164_v0 }
 0x4e8   :  { %v327_v10 = vpop.f32.mrb[2].mxu0 }
 0x4e9   :  { %v337_v12 = vmul.f32 %v335_v9, %v327_v10  ;;  %v1023_v13 = vpop.f32.mrb[3].mxu0  ;;  %v331_v14 = vadd.f32 %v1234_v11, %v327_v10 }
 0x4eb   :  { %339 = vrot.lane.b32.xlu1 %v337_v12, %s1168_s24  ;;  %v332_v16 = vadd.f32 %v933_v15, %v331_v14  ;;  %v939_v14 = vld [vmem:[%s1370_s0 + $0x8] sm:$0x3] }
 0x55d   :  { %v340_v17 = vpop.permute.xlu1 %339 }
 0x55e   :  { %v342_v18 = vadd.f32 %v340_v17, %v332_v16 }
 0x560   :  { %v343_v19 = vsel %vm18_vm0, %v342_v18, 0.0  ;;  %v346_v20 = vmul.f32 %v342_v18, %v342_v18 }
 0x561   :  { %344 = vadd.xlane.f32.xlu0 %v343_v19 }
 0x562   :  { %v347_v21 = vsel %vm18_vm0, %v346_v20, 0.0 }
 0x563   :  { %348 = vadd.xlane.f32.xlu1 %v347_v21 }
 0x577   :  { %445 = vrot.lane.b32.xlu0 %v933_v15, %s1167_s1 }
 0x5ee   :  { %v345_v22 = vpop.xlane.xlu0 %344 }
 0x5ef   :  { %v350_v23 = vmul.f32 0.03125, %v345_v22 }
 0x5f0   :  { %v349_v24 = vpop.xlane.xlu1 %348 }
 0x5f1   :  { %v352_v25 = vmul.f32 %v350_v23, %v350_v23  ;;  %v351_v26 = vmul.f32 0.03125, %v349_v24  ;;  %v355_v30 = vsub.f32 %v342_v18, %v350_v23 }
 0x5f2   :  { %v446_v39 = vpop.permute.xlu0 %445 }
 0x5f3   :  { %v353_v27 = vsub.f32 %v351_v26, %v352_v25 }
 0x5f5   :  { %v354_v28 = vmax.f32 %v353_v27, 0.0 }
 0x5f7   :  { %v356_v29 = vadd.f32 1e-05, %v354_v28 }
 0x5f9   :  { %1140 = vrsqrt.f32 %v356_v29 }
 0x603   :  { %v1141_v31 = vpop.eup %1140 }
 0x604   :  { %v358_v32 = vmul.f32 %v1141_v31, %v355_v30 }
 0x606   :  { %v360_v33 = vmul.f32 0.70710677, %v358_v32  ;;  %v359_v35 = vmul.f32 0.5, %v358_v32 }
 0x608   :  { %1142 = verf.f32 %v360_v33 }
 0x612   :  { %v1143_v34 = vpop.eup %1142 }
 0x613   :  { %v362_v36 = vadd.f32 1.0, %v1143_v34 }
 0x615   :  { %v363_v37 = vmul.f32 %v362_v36, %v359_v35 }
 0x617   :  { %v364_v38 = vadd.f32 %v363_v37, %v253_v8 }
 0x619   :  { %935 = vst.msk [vmem:[%s1371_s3 + $0x4] sm:$0x3] %vm18_vm0, %v364_v38  ;;  %1033 = vmatmul.mubr.msk.f32.vlgmr.msra.gmra.mrb[2].mxu1 %vm35_vm2, %v364_v38 }
 0x61a   :  { %1111 = vmatpush3.bf16.msra.mxu1 %v1205_v5  ;;  %1054 = vmatprep.mubr.msk.f32.mxu1 %vm1165_vm1, %v1166_v4 }
 0x61b   :  { %1112 = vmatprep.subr.bf16.mxu1 %v1164_v0 }
 0x61e   :  { %1114 = vmatpush3.bf16.msra.mxu1 %v1214_v7 }
 0x61f   :  { %1121 = vmatprep.subr.bf16.mxu1 %v1164_v0 }
 0x6ec   :  { %v438_v40 = vpop.f32.mrb[2].mxu1 }
 0x6ed   :  { %v448_v41 = vmul.f32 %v446_v39, %v438_v40  ;;  %v1034_v42 = vpop.f32.mrb[3].mxu1  ;;  %v442_v43 = vadd.f32 %v1234_v11, %v438_v40 }
 0x6ef   :  { %450 = vrot.lane.b32.xlu1 %v448_v41, %s1168_s24  ;;  %v443_v45 = vadd.f32 %v936_v44, %v442_v43  ;;  %v942_v43 = vld [vmem:[%s1370_s0 + $0xa] sm:$0x3] }
 0x761   :  { %v451_v46 = vpop.permute.xlu1 %450 }
 0x762   :  { %v453_v47 = vadd.f32 %v451_v46, %v443_v45 }
 0x764   :  { %v454_v48 = vsel %vm18_vm0, %v453_v47, 0.0  ;;  %v457_v49 = vmul.f32 %v453_v47, %v453_v47 }
 0x765   :  { %455 = vadd.xlane.f32.xlu0 %v454_v48 }
 0x766   :  { %v458_v50 = vsel %vm18_vm0, %v457_v49, 0.0 }
 0x767   :  { %459 = vadd.xlane.f32.xlu1 %v458_v50 }
 0x77b   :  { %556 = vrot.lane.b32.xlu0 %v936_v44, %s1167_s1 }
 0x7f2   :  { %v456_v51 = vpop.xlane.xlu0 %455 }
 0x7f3   :  { %v461_v52 = vmul.f32 0.03125, %v456_v51 }
 0x7f4   :  { %v460_v53 = vpop.xlane.xlu1 %459 }
 0x7f5   :  { %v463_v54 = vmul.f32 %v461_v52, %v461_v52  ;;  %v462_v55 = vmul.f32 0.03125, %v460_v53  ;;  %v466_v59 = vsub.f32 %v453_v47, %v461_v52 }
 0x7f6   :  { %v557_v8 = vpop.permute.xlu0 %556 }
 0x7f7   :  { %v464_v56 = vsub.f32 %v462_v55, %v463_v54 }
 0x7f9   :  { %v465_v57 = vmax.f32 %v464_v56, 0.0 }
 0x7fb   :  { %v467_v58 = vadd.f32 1e-05, %v465_v57 }
 0x7fd   :  { %1144 = vrsqrt.f32 %v467_v58 }
 0x807   :  { %v1145_v60 = vpop.eup %1144 }
 0x808   :  { %v469_v61 = vmul.f32 %v1145_v60, %v466_v59 }
 0x80a   :  { %v471_v62 = vmul.f32 0.70710677, %v469_v61  ;;  %v470_v1 = vmul.f32 0.5, %v469_v61 }
 0x80c   :  { %1146 = verf.f32 %v471_v62 }
 0x816   :  { %v1147_v63 = vpop.eup %1146 }
 0x817   :  { %v473_v2 = vadd.f32 1.0, %v1147_v63 }
 0x819   :  { %v474_v3 = vmul.f32 %v473_v2, %v470_v1 }
 0x81b   :  { %v475_v6 = vadd.f32 %v474_v3, %v364_v38 }
 0x81d   :  { %938 = vst.msk [vmem:[%s1371_s3 + $0x6] sm:$0x3] %vm18_vm0, %v475_v6  ;;  %1044 = vmatmul.mubr.msk.f32.vlgmr.msra.gmra.mrb[4].mxu0 %vm35_vm2, %v475_v6 }
 0x81e   :  { %1117 = vmatpush3.bf16.msra.mxu0 %v1205_v5  ;;  %1065 = vmatprep.mubr.msk.f32.mxu0 %vm1165_vm1, %v1166_v4 }
 0x81f   :  { %1118 = vmatprep.subr.bf16.mxu0 %v1164_v0 }
 0x822   :  { %1120 = vmatpush3.bf16.msra.mxu0 %v1214_v7 }
 0x8f0   :  { %v549_v9 = vpop.f32.mrb[4].mxu0 }
 0x8f1   :  { %v559_v10 = vmul.f32 %v557_v8, %v549_v9  ;;  %v1045_v12 = vpop.f32.mrb[5].mxu0  ;;  %v553_v13 = vadd.f32 %v1234_v11, %v549_v9  ;;  %v945_v8 = vld [vmem:[%s1370_s0 + $0xc] sm:$0x3] }
 0x8f3   :  { %561 = vrot.lane.b32.xlu1 %v559_v10, %s1168_s24  ;;  %v554_v15 = vadd.f32 %v939_v14, %v553_v13 }
 0x965   :  { %v562_v16 = vpop.permute.xlu1 %561 }
 0x966   :  { %v564_v17 = vadd.f32 %v562_v16, %v554_v15 }
 0x968   :  { %v565_v18 = vsel %vm18_vm0, %v564_v17, 0.0  ;;  %v568_v19 = vmul.f32 %v564_v17, %v564_v17 }
 0x969   :  { %566 = vadd.xlane.f32.xlu0 %v565_v18 }
 0x96a   :  { %v569_v20 = vsel %vm18_vm0, %v568_v19, 0.0 }
 0x96b   :  { %570 = vadd.xlane.f32.xlu1 %v569_v20 }
 0x97f   :  { %667 = vrot.lane.b32.xlu0 %v939_v14, %s1167_s1 }
 0x9f6   :  { %v567_v21 = vpop.xlane.xlu0 %566 }
 0x9f7   :  { %v572_v22 = vmul.f32 0.03125, %v567_v21 }
 0x9f8   :  { %v571_v23 = vpop.xlane.xlu1 %570 }
 0x9f9   :  { %v574_v24 = vmul.f32 %v572_v22, %v572_v22  ;;  %v573_v25 = vmul.f32 0.03125, %v571_v23  ;;  %v577_v29 = vsub.f32 %v564_v17, %v572_v22 }
 0x9fa   :  { %v668_v38 = vpop.permute.xlu0 %667 }
 0x9fb   :  { %v575_v26 = vsub.f32 %v573_v25, %v574_v24 }
 0x9fd   :  { %v576_v27 = vmax.f32 %v575_v26, 0.0 }
 0x9ff   :  { %v578_v28 = vadd.f32 1e-05, %v576_v27 }
 0xa01   :  { %1148 = vrsqrt.f32 %v578_v28 }
 0xa0b   :  { %v1149_v30 = vpop.eup %1148 }
 0xa0c   :  { %v580_v31 = vmul.f32 %v1149_v30, %v577_v29 }
 0xa0e   :  { %v582_v32 = vmul.f32 0.70710677, %v580_v31  ;;  %v581_v34 = vmul.f32 0.5, %v580_v31 }
 0xa10   :  { %1150 = verf.f32 %v582_v32 }
 0xa1a   :  { %v1151_v33 = vpop.eup %1150 }
 0xa1b   :  { %v584_v35 = vadd.f32 1.0, %v1151_v33  ;;  %v948_v33 = vld [vmem:[%s1370_s0 + $0xe] sm:$0x3] }
 0xa1c   :  { %923 = vst.msk [vmem:[#allocation3] sm:$0x3] %vm18_vm0, %v948_v33 }
 0xa1d   :  { %v585_v36 = vmul.f32 %v584_v35, %v581_v34 }
 0xa1f   :  { %v586_v37 = vadd.f32 %v585_v36, %v475_v6 }
 0xa21   :  { %941 = vst.msk [vmem:[%s1371_s3 + $0x8] sm:$0x3] %vm18_vm0, %v586_v37  ;;  %1055 = vmatmul.mubr.msk.f32.vlgmr.msra.gmra.mrb[4].mxu1 %vm35_vm2, %v586_v37 }
 0xa22   :  { %1123 = vmatpush3.bf16.msra.mxu1 %v1205_v5  ;;  %1076 = vmatprep.mubr.msk.f32.mxu1 %vm1165_vm1, %v1166_v4 }
 0xa23   :  { %1124 = vmatprep.subr.bf16.mxu1 %v1164_v0 }
 0xa26   :  { %1126 = vmatpush3.bf16.msra.mxu1 %v1214_v7 }
 0xaf4   :  { %v660_v39 = vpop.f32.mrb[4].mxu1 }
 0xaf5   :  { %v670_v40 = vmul.f32 %v668_v38, %v660_v39  ;;  %v1056_v41 = vpop.f32.mrb[5].mxu1  ;;  %v664_v42 = vadd.f32 %v1234_v11, %v660_v39 }
 0xaf7   :  { %672 = vrot.lane.b32.xlu1 %v670_v40, %s1168_s24  ;;  %v665_v5 = vadd.f32 %v942_v43, %v664_v42 }
 0xb69   :  { %v673_v44 = vpop.permute.xlu1 %672 }
 0xb6a   :  { %v675_v45 = vadd.f32 %v673_v44, %v665_v5 }
 0xb6c   :  { %v676_v4 = vsel %vm18_vm0, %v675_v45, 0.0  ;;  %v679_v0 = vmul.f32 %v675_v45, %v675_v45 }
 0xb6d   :  { %677 = vadd.xlane.f32.xlu0 %v676_v4 }
 0xb6e   :  { %v680_v7 = vsel %vm18_vm0, %v679_v0, 0.0 }
 0xb6f   :  { %681 = vadd.xlane.f32.xlu1 %v680_v7 }
 0xb83   :  { %778 = vrot.lane.b32.xlu0 %v942_v43, %s1167_s1 }
 0xbfa   :  { %v678_v46 = vpop.xlane.xlu0 %677 }
 0xbfb   :  { %v683_v47 = vmul.f32 0.03125, %v678_v46 }
 0xbfc   :  { %v682_v48 = vpop.xlane.xlu1 %681 }
 0xbfd   :  { %v685_v49 = vmul.f32 %v683_v47, %v683_v47  ;;  %v684_v50 = vmul.f32 0.03125, %v682_v48  ;;  %v688_v54 = vsub.f32 %v675_v45, %v683_v47 }
 0xbfe   :  { %v779_v63 = vpop.permute.xlu0 %778 }
 0xbff   :  { %v686_v51 = vsub.f32 %v684_v50, %v685_v49 }
 0xc01   :  { %v687_v52 = vmax.f32 %v686_v51, 0.0 }
 0xc03   :  { %v689_v53 = vadd.f32 1e-05, %v687_v52 }
 0xc05   :  { %1152 = vrsqrt.f32 %v689_v53 }
 0xc0f   :  { %v1153_v55 = vpop.eup %1152 }
 0xc10   :  { %v691_v56 = vmul.f32 %v1153_v55, %v688_v54 }
 0xc12   :  { %v693_v57 = vmul.f32 0.70710677, %v691_v56  ;;  %v692_v59 = vmul.f32 0.5, %v691_v56 }
 0xc14   :  { %1154 = verf.f32 %v693_v57 }
 0xc1e   :  { %v1155_v58 = vpop.eup %1154 }
 0xc1f   :  { %v695_v60 = vadd.f32 1.0, %v1155_v58 }
 0xc21   :  { %v696_v61 = vmul.f32 %v695_v60, %v692_v59 }
 0xc23   :  { %v697_v62 = vadd.f32 %v696_v61, %v586_v37 }
 0xc25   :  { %944 = vst.msk [vmem:[%s1371_s3 + $0xa] sm:$0x3] %vm18_vm0, %v697_v62  ;;  %1066 = vmatmul.mubr.msk.f32.vlgmr.msra.gmra.mrb[6].mxu0 %vm35_vm2, %v697_v62 }
 0xcf8   :  { %v771_v1 = vpop.f32.mrb[6].mxu0 }
 0xcf9   :  { %v781_v2 = vmul.f32 %v779_v63, %v771_v1  ;;  %v1067_v3 = vpop.f32.mrb[7].mxu0  ;;  %v775_v6 = vadd.f32 %v1234_v11, %v771_v1 }
 0xcfb   :  { %783 = vrot.lane.b32.xlu1 %v781_v2, %s1168_s24  ;;  %v776_v9 = vadd.f32 %v945_v8, %v775_v6 }
 0xd6d   :  { %v784_v10 = vpop.permute.xlu1 %783 }
 0xd6e   :  { %v786_v12 = vadd.f32 %v784_v10, %v776_v9 }
 0xd70   :  { %v787_v13 = vsel %vm18_vm0, %v786_v12, 0.0  ;;  %v790_v14 = vmul.f32 %v786_v12, %v786_v12 }
 0xd71   :  { %788 = vadd.xlane.f32.xlu0 %v787_v13 }
 0xd72   :  { %v791_v15 = vsel %vm18_vm0, %v790_v14, 0.0 }
 0xd73   :  { %792 = vadd.xlane.f32.xlu1 %v791_v15 }
 0xd87   :  { %889 = vrot.lane.b32.xlu0 %v945_v8, %s1167_s1 }
 0xdfe   :  { %v789_v16 = vpop.xlane.xlu0 %788 }
 0xdff   :  { %v794_v17 = vmul.f32 0.03125, %v789_v16 }
 0xe00   :  { %v793_v18 = vpop.xlane.xlu1 %792 }
 0xe01   :  { %v796_v19 = vmul.f32 %v794_v17, %v794_v17  ;;  %v795_v20 = vmul.f32 0.03125, %v793_v18  ;;  %v799_v24 = vsub.f32 %v786_v12, %v794_v17 }
 0xe02   :  { %v890_v34 = vpop.permute.xlu0 %889 }
 0xe03   :  { %v797_v21 = vsub.f32 %v795_v20, %v796_v19 }
 0xe05   :  { %v798_v22 = vmax.f32 %v797_v21, 0.0 }
 0xe07   :  { %v800_v23 = vadd.f32 1e-05, %v798_v22 }
 0xe09   :  { %1156 = vrsqrt.f32 %v800_v23 }
 0xe13   :  { %v1157_v25 = vpop.eup %1156 }
 0xe14   :  { %v802_v26 = vmul.f32 %v1157_v25, %v799_v24 }
 0xe16   :  { %v804_v27 = vmul.f32 0.70710677, %v802_v26  ;;  %v803_v29 = vmul.f32 0.5, %v802_v26 }
 0xe18   :  { %1158 = verf.f32 %v804_v27 }
 0xe22   :  { %v1159_v28 = vpop.eup %1158 }
 0xe23   :  { %v806_v30 = vadd.f32 1.0, %v1159_v28 }
 0xe25   :  { %v807_v31 = vmul.f32 %v806_v30, %v803_v29 }
 0xe27   :  { %v808_v32 = vadd.f32 %v807_v31, %v697_v62 }
 0xe29   :  { %947 = vst.msk [vmem:[%s1371_s3 + $0xc] sm:$0x3] %vm18_vm0, %v808_v32  ;;  %1077 = vmatmul.mubr.msk.f32.vlgmr.msra.gmra.mrb[6].mxu1 %vm35_vm2, %v808_v32 }
 0xefc   :  { %v882_v35 = vpop.f32.mrb[6].mxu1 }
 0xefd   :  { %v892_v36 = vmul.f32 %v890_v34, %v882_v35  ;;  %v1078_v37 = vpop.f32.mrb[7].mxu1  ;;  %v886_v38 = vadd.f32 %v1234_v11, %v882_v35 }
 0xeff   :  { %894 = vrot.lane.b32.xlu1 %v892_v36, %s1168_s24  ;;  %v887_v39 = vadd.f32 %v948_v33, %v886_v38 }
 0xf71   :  { %v895_v40 = vpop.permute.xlu1 %894 }
 0xf72   :  { %v897_v41 = vadd.f32 %v895_v40, %v887_v39 }
 0xf74   :  { %v898_v42 = vsel %vm18_vm0, %v897_v41, 0.0  ;;  %v901_v43 = vmul.f32 %v897_v41, %v897_v41 }
 0xf75   :  { %899 = vadd.xlane.f32.xlu0 %v898_v42 }
 0xf76   :  { %v902_v5 = vsel %vm18_vm0, %v901_v43, 0.0 }
 0xf77   :  { %903 = vadd.xlane.f32.xlu1 %v902_v5 }
0x1002   :  { %v900_v44 = vpop.xlane.xlu0 %899 }
0x1003   :  { %v905_v45 = vmul.f32 0.03125, %v900_v44 }
0x1004   :  { %v904_v4 = vpop.xlane.xlu1 %903 }
0x1005   :  { %v907_v0 = vmul.f32 %v905_v45, %v905_v45  ;;  %v906_v7 = vmul.f32 0.03125, %v904_v4  ;;  %v910_v11 = vsub.f32 %v897_v41, %v905_v45 }
0x1007   :  { %v908_v46 = vsub.f32 %v906_v7, %v907_v0 }
0x1009   :  { %v909_v47 = vmax.f32 %v908_v46, 0.0 }
0x100b   :  { %v911_v48 = vadd.f32 1e-05, %v909_v47 }
0x100d   :  { %1160 = vrsqrt.f32 %v911_v48 }
0x1017   :  { %v1161_v49 = vpop.eup %1160 }
0x1018   :  { %v913_v50 = vmul.f32 %v1161_v49, %v910_v11 }
0x101a   :  { %v915_v51 = vmul.f32 0.70710677, %v913_v50  ;;  %v914_v53 = vmul.f32 0.5, %v913_v50 }
0x101c   :  { %1162 = verf.f32 %v915_v51 }
0x1026   :  { %v1163_v52 = vpop.eup %1162 }
0x1027   :  { %v917_v54 = vadd.f32 1.0, %v1163_v52 }
0x1029   :  { %v918_v55 = vmul.f32 %v917_v54, %v914_v53 }
0x102b   :  { %v919_v56 = vadd.f32 %v918_v55, %v808_v32 }
0x102d   :  { %950 = vst.msk [vmem:[%s1371_s3 + $0xe] sm:$0x3] %vm18_vm0, %v919_v56  ;;  %922 = vst.msk [vmem:[#allocation2] sm:$0x3] %vm18_vm0, %v919_v56 }

</bundles_post_ra>
